<compile_context>
chip_gen: v7x
topology: tpu7x:2x2x1
jax: 0.10.0
libtpu: 0.0.40
codegen_flags: <defaults>
</compile_context>

<pallas_src>
import functools

import jax
import jax.numpy as jnp
from jax.experimental import pallas as pl
from jax.experimental.pallas import tpu as pltpu


def _mf_kernel(users_ref, items_ref, ue_ref, ie_ref, out_ref, acc_u, acc_i):
    """One (batch_tile, row_tile) grid step.

    users_ref/items_ref: (1, TB) int32 indices (lane-dense, -1 = padding)
    ue_ref/ie_ref:       (F_pad, TR) transposed, bias-augmented table tiles
    out_ref:             (1, TB) float32 predictions (lane-dense)
    acc_u/acc_i:         (F_pad, TB) float32 gathered-row accumulators
    """
    rt = pl.program_id(1)

    @pl.when(rt == 0)
    def _():
        acc_u[...] = jnp.zeros_like(acc_u)
        acc_i[...] = jnp.zeros_like(acc_i)

    TR = ue_ref.shape[1]
    TB = users_ref.shape[1]

    # Row ids covered by this table tile: (TR, TB), rows on sublanes,
    # batch on lanes.
    row_ids = jax.lax.broadcasted_iota(jnp.int32, (TR, TB), 0) + rt * TR

    # One-hot gather on the MXU: (F_pad, TR) @ (TR, TB) -> (F_pad, TB).
    oh_u = (row_ids == users_ref[...]).astype(ue_ref.dtype)
    oh_i = (row_ids == items_ref[...]).astype(ie_ref.dtype)
    acc_u[...] += jnp.dot(ue_ref[...], oh_u, preferred_element_type=jnp.float32)
    acc_i[...] += jnp.dot(ie_ref[...], oh_i, preferred_element_type=jnp.float32)

    # Finalize: row-wise dot over the (bias-augmented) factor axis -> (1, TB).
    @pl.when(rt == pl.num_programs(1) - 1)
    def _():
        out_ref[...] = jnp.sum(acc_u[...] * acc_i[...], axis=0, keepdims=True)


@functools.partial(jax.jit, static_argnames=("batch_tile", "row_tile"))
def mf_forward(users, items, user_emb, item_emb, user_bias, item_bias,
               *, batch_tile=256, row_tile=256):
    """Equivalent of BaseModule.forward(users, items) with dropout_p == 0."""
    B = users.shape[0]
    n_users, n_factors = user_emb.shape
    n_items = item_emb.shape[0]
    dtype = user_emb.dtype

    # Fold biases into the contraction dimension:
    #   <[ue | b_u | 1], [ie | 1 | b_i]> = <ue, ie> + b_u + b_i
    ue_aug = jnp.concatenate(
        [user_emb, user_bias.astype(dtype), jnp.ones((n_users, 1), dtype)], axis=1)
    ie_aug = jnp.concatenate(
        [item_emb, jnp.ones((n_items, 1), dtype), item_bias.astype(dtype)], axis=1)

    f_aug = n_factors + 2
    f_pad = ((f_aug + 7) // 8) * 8                       # sublane-aligned factors
    r_pad = ((max(n_users, n_items) + row_tile - 1) // row_tile) * row_tile
    b_pad = ((B + batch_tile - 1) // batch_tile) * batch_tile

    # Transposed, zero-padded tables: (F_pad, R_pad); rows on the lane axis.
    ue_t = jnp.zeros((f_pad, r_pad), dtype).at[:f_aug, :n_users].set(ue_aug.T)
    ie_t = jnp.zeros((f_pad, r_pad), dtype).at[:f_aug, :n_items].set(ie_aug.T)

    # Lane-dense index vectors; padding index -1 matches no table row.
    users_p = jnp.full((1, b_pad), -1, jnp.int32).at[0, :B].set(users.astype(jnp.int32))
    items_p = jnp.full((1, b_pad), -1, jnp.int32).at[0, :B].set(items.astype(jnp.int32))

    grid = (b_pad // batch_tile, r_pad // row_tile)
    out = pl.pallas_call(
        _mf_kernel,
        out_shape=jax.ShapeDtypeStruct((1, b_pad), jnp.float32),
        grid_spec=pltpu.PrefetchScalarGridSpec(
            num_scalar_prefetch=0,
            grid=grid,
            in_specs=[
                pl.BlockSpec((1, batch_tile), lambda bt, rt: (0, bt)),      # users
                pl.BlockSpec((1, batch_tile), lambda bt, rt: (0, bt)),      # items
                pl.BlockSpec((f_pad, row_tile), lambda bt, rt: (0, rt)),    # user table
                pl.BlockSpec((f_pad, row_tile), lambda bt, rt: (0, rt)),    # item table
            ],
            out_specs=pl.BlockSpec((1, batch_tile), lambda bt, rt: (0, bt)),
            scratch_shapes=[
                pltpu.VMEM((f_pad, batch_tile), jnp.float32),  # gathered user rows
                pltpu.VMEM((f_pad, batch_tile), jnp.float32),  # gathered item rows
            ],
        ),
        compiler_params=pltpu.CompilerParams(
            dimension_semantics=("parallel", "arbitrary"),
        ),
    )(users_p, items_p, ue_t, ie_t)

    # matches `preds.squeeze()` in the PyTorch module (for batch > 1)
    return out[0, :B]


if __name__ == "__main__":
    # Module hyperparameters (synthetic, deterministic init like nn.Embedding: N(0,1)).
    n_users, n_items, n_factors = 64, 128, 32
    batch = 8

    key = jax.random.PRNGKey(0)
    k_ue, k_ie, k_ub, k_ib, k_u, k_i = jax.random.split(key, 6)
    user_emb = jax.random.normal(k_ue, (n_users, n_factors), dtype=jnp.float32)
    item_emb = jax.random.normal(k_ie, (n_items, n_factors), dtype=jnp.float32)
    user_bias = jax.random.normal(k_ub, (n_users, 1), dtype=jnp.float32)
    item_bias = jax.random.normal(k_ib, (n_items, 1), dtype=jnp.float32)

    users = jax.random.randint(k_u, (batch,), 0, n_users, dtype=jnp.int32)
    items = jax.random.randint(k_i, (batch,), 0, n_items, dtype=jnp.int32)

    # --- f32 tables (matches the PyTorch module's f32 parameters) ---
    preds = mf_forward(users, items, user_emb, item_emb, user_bias, item_bias)
    preds = jax.block_until_ready(preds)

    ref = (user_bias[users, 0] + item_bias[items, 0]
           + jnp.sum(user_emb[users] * item_emb[items], axis=1))
    assert preds.shape == (batch,)
    assert jnp.allclose(preds, ref, atol=1e-3, rtol=1e-3)

    # --- bf16 tables (halved HBM traffic; MXU accumulates in f32) ---
    ue_b = user_emb.astype(jnp.bfloat16)
    ie_b = item_emb.astype(jnp.bfloat16)
    ub_b = user_bias.astype(jnp.bfloat16)
    ib_b = item_bias.astype(jnp.bfloat16)
    preds_b = jax.block_until_ready(mf_forward(users, items, ue_b, ie_b, ub_b, ib_b))
    ref_b = (ub_b.astype(jnp.float32)[users, 0] + ib_b.astype(jnp.float32)[items, 0]
             + jnp.sum(ue_b.astype(jnp.float32)[users]
                       * ie_b.astype(jnp.float32)[items], axis=1))
    assert jnp.allclose(preds_b, ref_b, atol=5e-2, rtol=5e-2)

    print("KERNEL_OK")
</pallas_src>

<mosaic_0001>
module attributes {stable_mosaic.version = 11 : i64} {
  func.func @_mf_kernel(%arg0: i32, %arg1: i32, %arg2: memref<1x256xi32, #tpu.memory_space<vmem>>, %arg3: memref<1x256xi32, #tpu.memory_space<vmem>>, %arg4: memref<40x256xf32, #tpu.memory_space<vmem>>, %arg5: memref<40x256xf32, #tpu.memory_space<vmem>>, %arg6: memref<1x256xf32, #tpu.memory_space<vmem>>, %arg7: memref<40x256xf32, #tpu.memory_space<vmem>>, %arg8: memref<40x256xf32, #tpu.memory_space<vmem>>) attributes {dimension_semantics = [#tpu.dimension_semantics<parallel>, #tpu.dimension_semantics<arbitrary>], iteration_bounds = array<i64: 1, 1>, scalar_prefetch = 0 : i64, scratch_operands = 2 : i64, tpu.core_type = #tpu.core_type<tc>, window_params = [{transform_indices = @transform_0, window_bounds = array<i64: 1, 256>}, {transform_indices = @transform_1, window_bounds = array<i64: 1, 256>}, {transform_indices = @transform_2, window_bounds = array<i64: 40, 256>}, {transform_indices = @transform_3, window_bounds = array<i64: 40, 256>}, {transform_indices = @transform_4, window_bounds = array<i64: 1, 256>}]} {
    %c0_i32 = arith.constant 0 : i32
    %0 = arith.cmpi eq, %arg1, %c0_i32 : i32
    %1 = arith.extui %0 : i1 to i32
    %c0_i32_0 = arith.constant 0 : i32
    %2 = arith.cmpi ne, %1, %c0_i32_0 : i32
    scf.if %2 {
      %cst_19 = arith.constant 0.000000e+00 : f32
      %30 = vector.broadcast %cst_19 : f32 to vector<40x256xf32>
      %c0_20 = arith.constant 0 : index
      %c0_21 = arith.constant 0 : index
      %31 = vector.load %arg7[%c0_20, %c0_21] : memref<40x256xf32, #tpu.memory_space<vmem>>, vector<40x256xf32>
      tpu.vector_store %arg7[%c0_20, %c0_21], %30 {strides = array<i32>} : memref<40x256xf32, #tpu.memory_space<vmem>>, vector<40x256xf32>,
      %cst_22 = arith.constant 0.000000e+00 : f32
      %32 = vector.broadcast %cst_22 : f32 to vector<40x256xf32>
      %c0_23 = arith.constant 0 : index
      %c0_24 = arith.constant 0 : index
      %33 = vector.load %arg8[%c0_23, %c0_24] : memref<40x256xf32, #tpu.memory_space<vmem>>, vector<40x256xf32>
      tpu.vector_store %arg8[%c0_23, %c0_24], %32 {strides = array<i32>} : memref<40x256xf32, #tpu.memory_space<vmem>>, vector<40x256xf32>,
    } else {
    }
    %3 = tpu.iota {dimensions = array<i32: 0>} : vector<256x256xi32>
    %c256_i32 = arith.constant 256 : i32
    %4 = arith.muli %arg1, %c256_i32 : i32
    %5 = vector.broadcast %4 : i32 to vector<256x256xi32>
    %6 = arith.addi %3, %5 : vector<256x256xi32>
    %c0 = arith.constant 0 : index
    %c0_1 = arith.constant 0 : index
    %7 = vector.load %arg2[%c0, %c0_1] : memref<1x256xi32, #tpu.memory_space<vmem>>, vector<1x256xi32>
    %8 = vector.broadcast %7 : vector<1x256xi32> to vector<256x256xi32>
    %9 = arith.cmpi eq, %6, %8 : vector<256x256xi32>
    %10 = arith.extui %9 : vector<256x256xi1> to vector<256x256xi32>
    %11 = arith.sitofp %10 : vector<256x256xi32> to vector<256x256xf32>
    %c0_2 = arith.constant 0 : index
    %c0_3 = arith.constant 0 : index
    %12 = vector.load %arg3[%c0_2, %c0_3] : memref<1x256xi32, #tpu.memory_space<vmem>>, vector<1x256xi32>
    %13 = vector.broadcast %12 : vector<1x256xi32> to vector<256x256xi32>
    %14 = arith.cmpi eq, %6, %13 : vector<256x256xi32>
    %15 = arith.extui %14 : vector<256x256xi1> to vector<256x256xi32>
    %16 = arith.sitofp %15 : vector<256x256xi32> to vector<256x256xf32>
    %c0_4 = arith.constant 0 : index
    %c0_5 = arith.constant 0 : index
    %17 = vector.load %arg7[%c0_4, %c0_5] : memref<40x256xf32, #tpu.memory_space<vmem>>, vector<40x256xf32>
    %c0_6 = arith.constant 0 : index
    %c0_7 = arith.constant 0 : index
    %18 = vector.load %arg4[%c0_6, %c0_7] : memref<40x256xf32, #tpu.memory_space<vmem>>, vector<40x256xf32>
    %cst = arith.constant dense<0.000000e+00> : vector<40x256xf32>
    %19 = tpu.matmul %18, %11, %cst {dimension_numbers = #tpu.dot_dimension_numbers<[1], [0], [0], [1], [0, 0, 1, 1], [], []>} : vector<40x256xf32>, vector<256x256xf32>, vector<40x256xf32> -> vector<40x256xf32>
    %20 = arith.addf %17, %19 : vector<40x256xf32>
    %c0_8 = arith.constant 0 : index
    %c0_9 = arith.constant 0 : index
    %21 = vector.load %arg7[%c0_8, %c0_9] : memref<40x256xf32, #tpu.memory_space<vmem>>, vector<40x256xf32>
    tpu.vector_store %arg7[%c0_8, %c0_9], %20 {strides = array<i32>} : memref<40x256xf32, #tpu.memory_space<vmem>>, vector<40x256xf32>,
    %c0_10 = arith.constant 0 : index
    %c0_11 = arith.constant 0 : index
    %22 = vector.load %arg8[%c0_10, %c0_11] : memref<40x256xf32, #tpu.memory_space<vmem>>, vector<40x256xf32>
    %c0_12 = arith.constant 0 : index
    %c0_13 = arith.constant 0 : index
    %23 = vector.load %arg5[%c0_12, %c0_13] : memref<40x256xf32, #tpu.memory_space<vmem>>, vector<40x256xf32>
    %cst_14 = arith.constant dense<0.000000e+00> : vector<40x256xf32>
    %24 = tpu.matmul %23, %16, %cst_14 {dimension_numbers = #tpu.dot_dimension_numbers<[1], [0], [0], [1], [0, 0, 1, 1], [], []>} : vector<40x256xf32>, vector<256x256xf32>, vector<40x256xf32> -> vector<40x256xf32>
    %25 = arith.addf %22, %24 : vector<40x256xf32>
    %c0_15 = arith.constant 0 : index
    %c0_16 = arith.constant 0 : index
    %26 = vector.load %arg8[%c0_15, %c0_16] : memref<40x256xf32, #tpu.memory_space<vmem>>, vector<40x256xf32>
    tpu.vector_store %arg8[%c0_15, %c0_16], %25 {strides = array<i32>} : memref<40x256xf32, #tpu.memory_space<vmem>>, vector<40x256xf32>,
    %c0_i32_17 = arith.constant 0 : i32
    %27 = arith.cmpi eq, %arg1, %c0_i32_17 : i32
    %28 = arith.extui %27 : i1 to i32
    %c0_i32_18 = arith.constant 0 : i32
    %29 = arith.cmpi ne, %28, %c0_i32_18 : i32
    scf.if %29 {
      %c0_19 = arith.constant 0 : index
      %c0_20 = arith.constant 0 : index
      %30 = vector.load %arg7[%c0_19, %c0_20] : memref<40x256xf32, #tpu.memory_space<vmem>>, vector<40x256xf32>
      %c0_21 = arith.constant 0 : index
      %c0_22 = arith.constant 0 : index
      %31 = vector.load %arg8[%c0_21, %c0_22] : memref<40x256xf32, #tpu.memory_space<vmem>>, vector<40x256xf32>
      %32 = arith.mulf %30, %31 : vector<40x256xf32>
      %cst_23 = arith.constant dense<0.000000e+00> : vector<256xf32>
      %33 = vector.multi_reduction <add>, %32, %cst_23 [0] : vector<40x256xf32> to vector<256xf32>
      %34 = vector.shape_cast %33 : vector<256xf32> to vector<1x256xf32>
      %c0_24 = arith.constant 0 : index
      %c0_25 = arith.constant 0 : index
      %35 = vector.load %arg6[%c0_24, %c0_25] : memref<1x256xf32, #tpu.memory_space<vmem>>, vector<1x256xf32>
      tpu.vector_store %arg6[%c0_24, %c0_25], %34 {strides = array<i32>} : memref<1x256xf32, #tpu.memory_space<vmem>>, vector<1x256xf32>,
    } else {
    }
    return
  }
  func.func @transform_0(%arg0: i32, %arg1: i32) -> (i32, i32) {
    %c0_i32 = arith.constant 0 : i32
    %c0_i32_0 = arith.constant 0 : i32
    return %c0_i32, %arg0 : i32, i32
  }
  func.func @transform_1(%arg0: i32, %arg1: i32) -> (i32, i32) {
    %c0_i32 = arith.constant 0 : i32
    %c0_i32_0 = arith.constant 0 : i32
    return %c0_i32, %arg0 : i32, i32
  }
  func.func @transform_2(%arg0: i32, %arg1: i32) -> (i32, i32) {
    %c0_i32 = arith.constant 0 : i32
    %c0_i32_0 = arith.constant 0 : i32
    return %c0_i32, %arg1 : i32, i32
  }
  func.func @transform_3(%arg0: i32, %arg1: i32) -> (i32, i32) {
    %c0_i32 = arith.constant 0 : i32
    %c0_i32_0 = arith.constant 0 : i32
    return %c0_i32, %arg1 : i32, i32
  }
  func.func @transform_4(%arg0: i32, %arg1: i32) -> (i32, i32) {
    %c0_i32 = arith.constant 0 : i32
    %c0_i32_0 = arith.constant 0 : i32
    return %c0_i32, %arg0 : i32, i32
  }
}

</mosaic_0001>

<bundles_post_ra>
// kernel: mf_forward.1
= control target key start
LH: loop header
LB: loop body
LE: loop exit
PB: predicated region body
PF: predicated region fallthrough
CT: control target
= control target key end

     0   :  { %v41_v0 = vlaneseq  ;;  %v1246_v15 = vmov 1.0|1.0   ;;  %s1584_s0 = inlined_call_operand.vmem [shape: s32[1,256], index: 0, kind: input, shape index: {}]   ;;  %s1585_s1 = inlined_call_operand.vmem [shape: s32[1,256], index: 1, kind: input, shape index: {}]   ;;  %s1586_s2 = inlined_call_operand.vmem [shape: f32[40,256], index: 2, kind: input, shape index: {}]   ;;  %s1587_s3 = inlined_call_operand.vmem [shape: f32[40,256], index: 3, kind: input, shape index: {}]   ;;  %s1588_s4 = inlined_call_operand.vmem [shape: f32[1,256], index: 4, kind: output, shape index: {}]  }
   0x1   :  { %v521_v1 = vld [vmem:[%s1586_s2 + $0x8] sm:$0xff]  ;;  %v108_v4 = vld [vmem:[%s1584_s0] sm:$0x3]  ;;  %v523_v46 = vld [vmem:[%s1586_s2 + $0x18] sm:$0xff] }
   0x2   :  { %v1277_v2 = vshrl.u32 %v41_v0, 7  ;;  %594 = vmatprep.mubr.f32.mxu0 %v521_v1  ;;  %v656_v3 = vld [vmem:[%s1587_s3 + $0x8] sm:$0xff]  ;;  %v309_v5 = vld [vmem:[%s1585_s1] sm:$0x3]  ;;  %v658_v47 = vld [vmem:[%s1587_s3 + $0x18] sm:$0xff] }
   0x3   :  { %729 = vmatprep.mubr.f32.mxu1 %v656_v3  ;;  %v520_v44 = vld [vmem:[%s1586_s2] sm:$0xff]  ;;  %v522_v48 = vld [vmem:[%s1586_s2 + $0x10] sm:$0xff]  ;;  %v525_v50 = vld [vmem:[%s1586_s2 + $0x28] sm:$0xff] }
   0x4   :  { %v43_v6 = vadd.s32 8, %v1277_v2  ;;  %v115_v7 = vsub.s32 1, %v1277_v2  ;;  %v111_v8 = vsub.s32 0, %v1277_v2  ;;  %v44_v9 = vadd.s32 16, %v1277_v2  ;;  %v655_v45 = vld [vmem:[%s1587_s3] sm:$0xff]  ;;  %v657_v49 = vld [vmem:[%s1587_s3 + $0x10] sm:$0xff] }
   0x5   :  { %v45_v10 = vadd.s32 24, %v1277_v2  ;;  %v46_v16 = vadd.s32 32, %v1277_v2  ;;  %v47_v17 = vadd.s32 40, %v1277_v2  ;;  %v48_v18 = vadd.s32 48, %v1277_v2  ;;  %v660_v51 = vld [vmem:[%s1587_s3 + $0x28] sm:$0xff]  ;;  %v524_v52 = vld [vmem:[%s1586_s2 + $0x20] sm:$0xff] }
   0x6   :  { %v1293_v11 = vrot.slane %v108_v4, %v115_v7  ;;  %v1295_v12 = vrot.slane %v309_v5, %v115_v7  ;;  %v1297_v13 = vrot.slane %v108_v4, %v111_v8  ;;  %v1299_v14 = vrot.slane %v309_v5, %v111_v8  ;;  %v659_v53 = vld [vmem:[%s1587_s3 + $0x20] sm:$0xff]  ;;  %v527_v54 = vld [vmem:[%s1586_s2 + $0x38] sm:$0xff]  ;;  %v526_v56 = vld [vmem:[%s1586_s2 + $0x30] sm:$0xff] }
   0x7   :  { %v49_v19 = vadd.s32 56, %v1277_v2  ;;  %v50_v20 = vadd.s32 64, %v1277_v2  ;;  %v51_v21 = vadd.s32 72, %v1277_v2  ;;  %v52_v22 = vadd.s32 80, %v1277_v2  ;;  %v662_v55 = vld [vmem:[%s1587_s3 + $0x38] sm:$0xff]  ;;  %v661_v57 = vld [vmem:[%s1587_s3 + $0x30] sm:$0xff] }
   0x8   :  { %vm118_vm0 = vcmp.eq.s32.totalorder %v1277_v2, %v1293_v11  ;;  %vm120_vm1 = vcmp.eq.s32.totalorder %v43_v6, %v1293_v11  ;;  %vm319_vm2 = vcmp.eq.s32.totalorder %v1277_v2, %v1295_v12  ;;  %vm321_vm3 = vcmp.eq.s32.totalorder %v43_v6, %v1295_v12  ;;  %v529_v58 = vld [vmem:[%s1586_s2 + $0x48] sm:$0xff]  ;;  %v528_v60 = vld [vmem:[%s1586_s2 + $0x40] sm:$0xff] }
   0x9   :  { %vm1116_vm4 = vmpackc.low %vm120_vm1, %vm118_vm0  ;;  %vm117_vm5 = vcmp.eq.s32.totalorder %v1277_v2, %v1297_v13  ;;  %vm119_vm6 = vcmp.eq.s32.totalorder %v43_v6, %v1297_v13  ;;  %vm318_vm7 = vcmp.eq.s32.totalorder %v1277_v2, %v1299_v14  ;;  %vm320_vm8 = vcmp.eq.s32.totalorder %v43_v6, %v1299_v14  ;;  %v664_v59 = vld [vmem:[%s1587_s3 + $0x48] sm:$0xff]  ;;  %v663_v61 = vld [vmem:[%s1587_s3 + $0x40] sm:$0xff] }
   0xa   :  { %1117 = vmatprep.subr.msk.bf16.mxu0 %vm1116_vm4, %v1246_v15  ;;  %vm1180_vm9 = vmpackc.low %vm321_vm3, %vm319_vm2  ;;  %vm122_vm10 = vcmp.eq.s32.totalorder %v44_v9, %v1293_v11  ;;  %vm124_vm11 = vcmp.eq.s32.totalorder %v45_v10, %v1293_v11  ;;  %vm323_vm13 = vcmp.eq.s32.totalorder %v44_v9, %v1295_v12  ;;  %vm325_vm14 = vcmp.eq.s32.totalorder %v45_v10, %v1295_v12 }
   0xb   :  { %1181 = vmatprep.subr.msk.bf16.mxu1 %vm1180_vm9, %v1246_v15  ;;  %vm1118_vm12 = vmpackc.low %vm119_vm6, %vm117_vm5  ;;  %vm121_vm0 = vcmp.eq.s32.totalorder %v44_v9, %v1297_v13  ;;  %vm123_vm1 = vcmp.eq.s32.totalorder %v45_v10, %v1297_v13  ;;  %vm322_vm3 = vcmp.eq.s32.totalorder %v44_v9, %v1299_v14  ;;  %vm324_vm4 = vcmp.eq.s32.totalorder %v45_v10, %v1299_v14 }
   0xc   :  { %1119 = vmatpush1.bf16.msk.msra.mxu0 %vm1118_vm12, %v1246_v15  ;;  %vm1182_vm15 = vmpackc.low %vm320_vm8, %vm318_vm7  ;;  %vm126_vm6 = vcmp.eq.s32.totalorder %v46_v16, %v1293_v11  ;;  %vm128_vm9 = vcmp.eq.s32.totalorder %v47_v17, %v1293_v11  ;;  %vm327_vm8 = vcmp.eq.s32.totalorder %v46_v16, %v1295_v12  ;;  %vm125_vm12 = vcmp.eq.s32.totalorder %v46_v16, %v1297_v13 }
   0xd   :  { %1183 = vmatpush1.bf16.msk.msra.mxu1 %vm1182_vm15, %v1246_v15  ;;  %vm1120_vm2 = vmpackc.low %vm124_vm11, %vm122_vm10  ;;  %vm329_vm10 = vcmp.eq.s32.totalorder %v47_v17, %v1295_v12  ;;  %vm326_vm15 = vcmp.eq.s32.totalorder %v46_v16, %v1299_v14  ;;  %v53_v23 = vadd.s32 88, %v1277_v2  ;;  %v54_v24 = vadd.s32 96, %v1277_v2 }
   0xe   :  { %1121 = vmatprep.subr.msk.bf16.mxu0 %vm1120_vm2, %v1246_v15  ;;  %vm1184_vm5 = vmpackc.low %vm325_vm14, %vm323_vm13  ;;  %vm127_vm13 = vcmp.eq.s32.totalorder %v47_v17, %v1297_v13  ;;  %vm328_vm2 = vcmp.eq.s32.totalorder %v47_v17, %v1299_v14  ;;  %v55_v25 = vadd.s32 104, %v1277_v2  ;;  %v56_v26 = vadd.s32 112, %v1277_v2 }
   0xf   :  { %1185 = vmatprep.subr.msk.bf16.mxu1 %vm1184_vm5, %v1246_v15  ;;  %vm1122_vm7 = vmpackc.low %vm123_vm1, %vm121_vm0  ;;  %vm130_vm1 = vcmp.eq.s32.totalorder %v48_v18, %v1293_v11  ;;  %vm132_vm5 = vcmp.eq.s32.totalorder %v49_v19, %v1293_v11  ;;  %v57_v27 = vadd.s32 120, %v1277_v2  ;;  %v58_v28 = vadd.s32 128, %v1277_v2 }
  0x10   :  { %1123 = vmatpush1.bf16.msk.msra.mxu0 %vm1122_vm7, %v1246_v15  ;;  %vm1186_vm11 = vmpackc.low %vm324_vm4, %vm322_vm3  ;;  %vm331_vm4 = vcmp.eq.s32.totalorder %v48_v18, %v1295_v12  ;;  %vm129_vm7 = vcmp.eq.s32.totalorder %v48_v18, %v1297_v13  ;;  %v59_v29 = vadd.s32 136, %v1277_v2  ;;  %v60_v30 = vadd.s32 144, %v1277_v2 }
  0x11   :  { %1187 = vmatpush1.bf16.msk.msra.mxu1 %vm1186_vm11, %v1246_v15  ;;  %vm1124_vm14 = vmpackc.low %vm128_vm9, %vm126_vm6  ;;  %vm333_vm6 = vcmp.eq.s32.totalorder %v49_v19, %v1295_v12  ;;  %vm330_vm11 = vcmp.eq.s32.totalorder %v48_v18, %v1299_v14  ;;  %v61_v31 = vadd.s32 152, %v1277_v2  ;;  %v62_v32 = vadd.s32 160, %v1277_v2 }
  0x12   :  { %1125 = vmatprep.subr.msk.bf16.mxu0 %vm1124_vm14, %v1246_v15  ;;  %vm1188_vm0 = vmpackc.low %vm329_vm10, %vm327_vm8  ;;  %vm131_vm8 = vcmp.eq.s32.totalorder %v49_v19, %v1297_v13  ;;  %vm332_vm14 = vcmp.eq.s32.totalorder %v49_v19, %v1299_v14  ;;  %v63_v33 = vadd.s32 168, %v1277_v2  ;;  %v64_v34 = vadd.s32 176, %v1277_v2 }
  0x13   :  { %1189 = vmatprep.subr.msk.bf16.mxu1 %vm1188_vm0, %v1246_v15  ;;  %vm1126_vm3 = vmpackc.low %vm127_vm13, %vm125_vm12  ;;  %vm134_vm13 = vcmp.eq.s32.totalorder %v50_v20, %v1293_v11  ;;  %vm136_vm0 = vcmp.eq.s32.totalorder %v51_v21, %v1293_v11  ;;  %v65_v35 = vadd.s32 184, %v1277_v2  ;;  %v66_v36 = vadd.s32 192, %v1277_v2 }
  0x14   :  { %1127 = vmatpush1.bf16.msk.msra.mxu0 %vm1126_vm3, %v1246_v15  ;;  %vm1190_vm9 = vmpackc.low %vm328_vm2, %vm326_vm15  ;;  %vm335_vm2 = vcmp.eq.s32.totalorder %v50_v20, %v1295_v12  ;;  %vm133_vm3 = vcmp.eq.s32.totalorder %v50_v20, %v1297_v13  ;;  %v67_v37 = vadd.s32 200, %v1277_v2  ;;  %v68_v38 = vadd.s32 208, %v1277_v2 }
  0x15   :  { %1191 = vmatpush1.bf16.msk.msra.mxu1 %vm1190_vm9, %v1246_v15  ;;  %vm1128_vm10 = vmpackc.low %vm132_vm5, %vm130_vm1  ;;  %vm337_vm1 = vcmp.eq.s32.totalorder %v51_v21, %v1295_v12  ;;  %vm334_vm9 = vcmp.eq.s32.totalorder %v50_v20, %v1299_v14  ;;  %v69_v39 = vadd.s32 216, %v1277_v2  ;;  %v70_v40 = vadd.s32 224, %v1277_v2 }
  0x16   :  { %1129 = vmatprep.subr.msk.bf16.mxu0 %vm1128_vm10, %v1246_v15  ;;  %vm1192_vm12 = vmpackc.low %vm333_vm6, %vm331_vm4  ;;  %vm135_vm4 = vcmp.eq.s32.totalorder %v51_v21, %v1297_v13  ;;  %vm336_vm10 = vcmp.eq.s32.totalorder %v51_v21, %v1299_v14  ;;  %v71_v41 = vadd.s32 232, %v1277_v2  ;;  %v72_v42 = vadd.s32 240, %v1277_v2 }
  0x17   :  { %1193 = vmatprep.subr.msk.bf16.mxu1 %vm1192_vm12, %v1246_v15  ;;  %vm1130_vm15 = vmpackc.low %vm131_vm8, %vm129_vm7  ;;  %vm138_vm8 = vcmp.eq.s32.totalorder %v52_v22, %v1293_v11  ;;  %vm140_vm12 = vcmp.eq.s32.totalorder %v53_v23, %v1293_v11  ;;  %v73_v43 = vadd.s32 248, %v1277_v2 }
  0x18   :  { %1131 = vmatpush1.bf16.msk.msra.mxu0 %vm1130_vm15, %v1246_v15  ;;  %vm1194_vm5 = vmpackc.low %vm332_vm14, %vm330_vm11  ;;  %vm339_vm14 = vcmp.eq.s32.totalorder %v52_v22, %v1295_v12  ;;  %vm137_vm15 = vcmp.eq.s32.totalorder %v52_v22, %v1297_v13 }
  0x19   :  { %1195 = vmatpush1.bf16.msk.msra.mxu1 %vm1194_vm5, %v1246_v15  ;;  %vm1132_vm6 = vmpackc.low %vm136_vm0, %vm134_vm13  ;;  %vm341_vm13 = vcmp.eq.s32.totalorder %v53_v23, %v1295_v12  ;;  %vm338_vm5 = vcmp.eq.s32.totalorder %v52_v22, %v1299_v14 }
  0x1a   :  { %1133 = vmatprep.subr.msk.bf16.mxu0 %vm1132_vm6, %v1246_v15  ;;  %vm1196_vm7 = vmpackc.low %vm337_vm1, %vm335_vm2  ;;  %vm139_vm2 = vcmp.eq.s32.totalorder %v53_v23, %v1297_v13  ;;  %vm340_vm6 = vcmp.eq.s32.totalorder %v53_v23, %v1299_v14 }
  0x1b   :  { %1197 = vmatprep.subr.msk.bf16.mxu1 %vm1196_vm7, %v1246_v15  ;;  %vm1134_vm11 = vmpackc.low %vm135_vm4, %vm133_vm3  ;;  %vm142_vm4 = vcmp.eq.s32.totalorder %v54_v24, %v1293_v11  ;;  %vm144_vm7 = vcmp.eq.s32.totalorder %v55_v25, %v1293_v11 }
  0x1c   :  { %1135 = vmatpush1.bf16.msk.msra.mxu0 %vm1134_vm11, %v1246_v15  ;;  %vm1198_vm0 = vmpackc.low %vm336_vm10, %vm334_vm9  ;;  %vm343_vm10 = vcmp.eq.s32.totalorder %v54_v24, %v1295_v12  ;;  %vm141_vm11 = vcmp.eq.s32.totalorder %v54_v24, %v1297_v13 }
  0x1d   :  { %1199 = vmatpush1.bf16.msk.msra.mxu1 %vm1198_vm0, %v1246_v15  ;;  %vm1136_vm1 = vmpackc.low %vm140_vm12, %vm138_vm8  ;;  %vm345_vm8 = vcmp.eq.s32.totalorder %v55_v25, %v1295_v12  ;;  %vm342_vm0 = vcmp.eq.s32.totalorder %v54_v24, %v1299_v14 }
  0x1e   :  { %1137 = vmatprep.subr.msk.bf16.mxu0 %vm1136_vm1, %v1246_v15  ;;  %vm1200_vm3 = vmpackc.low %vm341_vm13, %vm339_vm14  ;;  %vm143_vm14 = vcmp.eq.s32.totalorder %v55_v25, %v1297_v13  ;;  %vm344_vm1 = vcmp.eq.s32.totalorder %v55_v25, %v1299_v14 }
  0x1f   :  { %1201 = vmatprep.subr.msk.bf16.mxu1 %vm1200_vm3, %v1246_v15  ;;  %vm1138_vm9 = vmpackc.low %vm139_vm2, %vm137_vm15  ;;  %vm146_vm2 = vcmp.eq.s32.totalorder %v56_v26, %v1293_v11  ;;  %vm148_vm3 = vcmp.eq.s32.totalorder %v57_v27, %v1293_v11 }
  0x20   :  { %1139 = vmatpush1.bf16.msk.msra.mxu0 %vm1138_vm9, %v1246_v15  ;;  %vm1202_vm12 = vmpackc.low %vm340_vm6, %vm338_vm5  ;;  %vm347_vm6 = vcmp.eq.s32.totalorder %v56_v26, %v1295_v12  ;;  %vm145_vm9 = vcmp.eq.s32.totalorder %v56_v26, %v1297_v13 }
  0x21   :  { %1203 = vmatpush1.bf16.msk.msra.mxu1 %vm1202_vm12, %v1246_v15  ;;  %vm1140_vm13 = vmpackc.low %vm144_vm7, %vm142_vm4  ;;  %vm349_vm4 = vcmp.eq.s32.totalorder %v57_v27, %v1295_v12  ;;  %vm346_vm12 = vcmp.eq.s32.totalorder %v56_v26, %v1299_v14 }
  0x22   :  { %1141 = vmatprep.subr.msk.bf16.mxu0 %vm1140_vm13, %v1246_v15  ;;  %vm1204_vm15 = vmpackc.low %vm345_vm8, %vm343_vm10  ;;  %vm147_vm10 = vcmp.eq.s32.totalorder %v57_v27, %v1297_v13  ;;  %vm348_vm13 = vcmp.eq.s32.totalorder %v57_v27, %v1299_v14 }
  0x23   :  { %1205 = vmatprep.subr.msk.bf16.mxu1 %vm1204_vm15, %v1246_v15  ;;  %vm1142_vm5 = vmpackc.low %vm143_vm14, %vm141_vm11  ;;  %vm150_vm14 = vcmp.eq.s32.totalorder %v58_v28, %v1293_v11  ;;  %vm152_vm15 = vcmp.eq.s32.totalorder %v59_v29, %v1293_v11 }
  0x24   :  { %1143 = vmatpush1.bf16.msk.msra.mxu0 %vm1142_vm5, %v1246_v15  ;;  %vm1206_vm7 = vmpackc.low %vm344_vm1, %vm342_vm0  ;;  %vm351_vm1 = vcmp.eq.s32.totalorder %v58_v28, %v1295_v12  ;;  %vm149_vm5 = vcmp.eq.s32.totalorder %v58_v28, %v1297_v13 }
  0x25   :  { %1207 = vmatpush1.bf16.msk.msra.mxu1 %vm1206_vm7, %v1246_v15  ;;  %vm1144_vm8 = vmpackc.low %vm148_vm3, %vm146_vm2  ;;  %vm353_vm2 = vcmp.eq.s32.totalorder %v59_v29, %v1295_v12  ;;  %vm350_vm7 = vcmp.eq.s32.totalorder %v58_v28, %v1299_v14 }
  0x26   :  { %1145 = vmatprep.subr.msk.bf16.mxu0 %vm1144_vm8, %v1246_v15  ;;  %vm1208_vm11 = vmpackc.low %vm349_vm4, %vm347_vm6  ;;  %vm151_vm6 = vcmp.eq.s32.totalorder %v59_v29, %v1297_v13  ;;  %vm352_vm8 = vcmp.eq.s32.totalorder %v59_v29, %v1299_v14 }
  0x27   :  { %1209 = vmatprep.subr.msk.bf16.mxu1 %vm1208_vm11, %v1246_v15  ;;  %vm1146_vm0 = vmpackc.low %vm147_vm10, %vm145_vm9  ;;  %vm154_vm10 = vcmp.eq.s32.totalorder %v60_v30, %v1293_v11  ;;  %vm156_vm11 = vcmp.eq.s32.totalorder %v61_v31, %v1293_v11 }
  0x28   :  { %1147 = vmatpush1.bf16.msk.msra.mxu0 %vm1146_vm0, %v1246_v15  ;;  %vm1210_vm3 = vmpackc.low %vm348_vm13, %vm346_vm12  ;;  %vm355_vm13 = vcmp.eq.s32.totalorder %v60_v30, %v1295_v12  ;;  %vm153_vm0 = vcmp.eq.s32.totalorder %v60_v30, %v1297_v13 }
  0x29   :  { %1211 = vmatpush1.bf16.msk.msra.mxu1 %vm1210_vm3, %v1246_v15  ;;  %vm1148_vm4 = vmpackc.low %vm152_vm15, %vm150_vm14  ;;  %vm357_vm14 = vcmp.eq.s32.totalorder %v61_v31, %v1295_v12  ;;  %vm354_vm3 = vcmp.eq.s32.totalorder %v60_v30, %v1299_v14 }
  0x2a   :  { %1149 = vmatprep.subr.msk.bf16.mxu0 %vm1148_vm4, %v1246_v15  ;;  %vm1212_vm9 = vmpackc.low %vm353_vm2, %vm351_vm1  ;;  %vm155_vm1 = vcmp.eq.s32.totalorder %v61_v31, %v1297_v13  ;;  %vm356_vm4 = vcmp.eq.s32.totalorder %v61_v31, %v1299_v14 }
  0x2b   :  { %1213 = vmatprep.subr.msk.bf16.mxu1 %vm1212_vm9, %v1246_v15  ;;  %vm1150_vm12 = vmpackc.low %vm151_vm6, %vm149_vm5  ;;  %vm158_vm6 = vcmp.eq.s32.totalorder %v62_v32, %v1293_v11  ;;  %vm160_vm9 = vcmp.eq.s32.totalorder %v63_v33, %v1293_v11 }
  0x2c   :  { %1151 = vmatpush1.bf16.msk.msra.mxu0 %vm1150_vm12, %v1246_v15  ;;  %vm1214_vm15 = vmpackc.low %vm352_vm8, %vm350_vm7  ;;  %vm359_vm8 = vcmp.eq.s32.totalorder %v62_v32, %v1295_v12  ;;  %vm157_vm12 = vcmp.eq.s32.totalorder %v62_v32, %v1297_v13 }
  0x2d   :  { %1215 = vmatpush1.bf16.msk.msra.mxu1 %vm1214_vm15, %v1246_v15  ;;  %vm1152_vm2 = vmpackc.low %vm156_vm11, %vm154_vm10  ;;  %vm361_vm10 = vcmp.eq.s32.totalorder %v63_v33, %v1295_v12  ;;  %vm358_vm15 = vcmp.eq.s32.totalorder %v62_v32, %v1299_v14 }
  0x2e   :  { %1153 = vmatprep.subr.msk.bf16.mxu0 %vm1152_vm2, %v1246_v15  ;;  %vm1216_vm5 = vmpackc.low %vm357_vm14, %vm355_vm13  ;;  %vm159_vm13 = vcmp.eq.s32.totalorder %v63_v33, %v1297_v13  ;;  %vm360_vm2 = vcmp.eq.s32.totalorder %v63_v33, %v1299_v14 }
  0x2f   :  { %1217 = vmatprep.subr.msk.bf16.mxu1 %vm1216_vm5, %v1246_v15  ;;  %vm1154_vm7 = vmpackc.low %vm155_vm1, %vm153_vm0  ;;  %vm162_vm1 = vcmp.eq.s32.totalorder %v64_v34, %v1293_v11  ;;  %vm164_vm5 = vcmp.eq.s32.totalorder %v65_v35, %v1293_v11 }
  0x30   :  { %1155 = vmatpush1.bf16.msk.msra.mxu0 %vm1154_vm7, %v1246_v15  ;;  %vm1218_vm11 = vmpackc.low %vm356_vm4, %vm354_vm3  ;;  %vm363_vm4 = vcmp.eq.s32.totalorder %v64_v34, %v1295_v12  ;;  %vm161_vm7 = vcmp.eq.s32.totalorder %v64_v34, %v1297_v13 }
  0x31   :  { %1219 = vmatpush1.bf16.msk.msra.mxu1 %vm1218_vm11, %v1246_v15  ;;  %vm1156_vm14 = vmpackc.low %vm160_vm9, %vm158_vm6  ;;  %vm365_vm6 = vcmp.eq.s32.totalorder %v65_v35, %v1295_v12  ;;  %vm362_vm11 = vcmp.eq.s32.totalorder %v64_v34, %v1299_v14 }
  0x32   :  { %1157 = vmatprep.subr.msk.bf16.mxu0 %vm1156_vm14, %v1246_v15  ;;  %vm1220_vm0 = vmpackc.low %vm361_vm10, %vm359_vm8  ;;  %vm163_vm8 = vcmp.eq.s32.totalorder %v65_v35, %v1297_v13  ;;  %vm364_vm14 = vcmp.eq.s32.totalorder %v65_v35, %v1299_v14 }
  0x33   :  { %1221 = vmatprep.subr.msk.bf16.mxu1 %vm1220_vm0, %v1246_v15  ;;  %vm1158_vm3 = vmpackc.low %vm159_vm13, %vm157_vm12  ;;  %vm166_vm13 = vcmp.eq.s32.totalorder %v66_v36, %v1293_v11  ;;  %vm168_vm0 = vcmp.eq.s32.totalorder %v67_v37, %v1293_v11 }
  0x34   :  { %1159 = vmatpush1.bf16.msk.msra.mxu0 %vm1158_vm3, %v1246_v15  ;;  %vm1222_vm9 = vmpackc.low %vm360_vm2, %vm358_vm15  ;;  %vm367_vm2 = vcmp.eq.s32.totalorder %v66_v36, %v1295_v12  ;;  %vm165_vm3 = vcmp.eq.s32.totalorder %v66_v36, %v1297_v13 }
  0x35   :  { %1223 = vmatpush1.bf16.msk.msra.mxu1 %vm1222_vm9, %v1246_v15  ;;  %vm1160_vm10 = vmpackc.low %vm164_vm5, %vm162_vm1  ;;  %vm369_vm1 = vcmp.eq.s32.totalorder %v67_v37, %v1295_v12  ;;  %vm366_vm9 = vcmp.eq.s32.totalorder %v66_v36, %v1299_v14 }
  0x36   :  { %1161 = vmatprep.subr.msk.bf16.mxu0 %vm1160_vm10, %v1246_v15  ;;  %vm1224_vm12 = vmpackc.low %vm365_vm6, %vm363_vm4  ;;  %vm167_vm4 = vcmp.eq.s32.totalorder %v67_v37, %v1297_v13  ;;  %vm368_vm10 = vcmp.eq.s32.totalorder %v67_v37, %v1299_v14 }
  0x37   :  { %1225 = vmatprep.subr.msk.bf16.mxu1 %vm1224_vm12, %v1246_v15  ;;  %vm1162_vm15 = vmpackc.low %vm163_vm8, %vm161_vm7  ;;  %vm170_vm8 = vcmp.eq.s32.totalorder %v68_v38, %v1293_v11  ;;  %vm172_vm12 = vcmp.eq.s32.totalorder %v69_v39, %v1293_v11 }
  0x38   :  { %1163 = vmatpush1.bf16.msk.msra.mxu0 %vm1162_vm15, %v1246_v15  ;;  %vm1226_vm5 = vmpackc.low %vm364_vm14, %vm362_vm11  ;;  %vm371_vm14 = vcmp.eq.s32.totalorder %v68_v38, %v1295_v12  ;;  %vm169_vm15 = vcmp.eq.s32.totalorder %v68_v38, %v1297_v13 }
  0x39   :  { %1227 = vmatpush1.bf16.msk.msra.mxu1 %vm1226_vm5, %v1246_v15  ;;  %vm1164_vm6 = vmpackc.low %vm168_vm0, %vm166_vm13  ;;  %vm373_vm13 = vcmp.eq.s32.totalorder %v69_v39, %v1295_v12  ;;  %vm370_vm5 = vcmp.eq.s32.totalorder %v68_v38, %v1299_v14 }
  0x3a   :  { %1165 = vmatprep.subr.msk.bf16.mxu0 %vm1164_vm6, %v1246_v15  ;;  %vm1228_vm7 = vmpackc.low %vm369_vm1, %vm367_vm2  ;;  %vm171_vm2 = vcmp.eq.s32.totalorder %v69_v39, %v1297_v13  ;;  %vm372_vm6 = vcmp.eq.s32.totalorder %v69_v39, %v1299_v14 }
  0x3b   :  { %1229 = vmatprep.subr.msk.bf16.mxu1 %vm1228_vm7, %v1246_v15  ;;  %vm1166_vm11 = vmpackc.low %vm167_vm4, %vm165_vm3  ;;  %vm174_vm4 = vcmp.eq.s32.totalorder %v70_v40, %v1293_v11  ;;  %vm176_vm7 = vcmp.eq.s32.totalorder %v71_v41, %v1293_v11 }
  0x3c   :  { %1167 = vmatpush1.bf16.msk.msra.mxu0 %vm1166_vm11, %v1246_v15  ;;  %vm1230_vm0 = vmpackc.low %vm368_vm10, %vm366_vm9  ;;  %vm375_vm10 = vcmp.eq.s32.totalorder %v70_v40, %v1295_v12  ;;  %vm173_vm11 = vcmp.eq.s32.totalorder %v70_v40, %v1297_v13 }
  0x3d   :  { %1231 = vmatpush1.bf16.msk.msra.mxu1 %vm1230_vm0, %v1246_v15  ;;  %vm1168_vm1 = vmpackc.low %vm172_vm12, %vm170_vm8  ;;  %vm377_vm8 = vcmp.eq.s32.totalorder %v71_v41, %v1295_v12  ;;  %vm374_vm0 = vcmp.eq.s32.totalorder %v70_v40, %v1299_v14 }
  0x3e   :  { %1169 = vmatprep.subr.msk.bf16.mxu0 %vm1168_vm1, %v1246_v15  ;;  %vm1232_vm3 = vmpackc.low %vm373_vm13, %vm371_vm14  ;;  %vm175_vm14 = vcmp.eq.s32.totalorder %v71_v41, %v1297_v13  ;;  %vm376_vm1 = vcmp.eq.s32.totalorder %v71_v41, %v1299_v14 }
  0x3f   :  { %1233 = vmatprep.subr.msk.bf16.mxu1 %vm1232_vm3, %v1246_v15  ;;  %vm1170_vm9 = vmpackc.low %vm171_vm2, %vm169_vm15  ;;  %vm178_vm2 = vcmp.eq.s32.totalorder %v72_v42, %v1293_v11  ;;  %vm180_vm3 = vcmp.eq.s32.totalorder %v73_v43, %v1293_v11 }
  0x40   :  { %1171 = vmatpush1.bf16.msk.msra.mxu0 %vm1170_vm9, %v1246_v15  ;;  %vm1234_vm12 = vmpackc.low %vm372_vm6, %vm370_vm5  ;;  %vm379_vm6 = vcmp.eq.s32.totalorder %v72_v42, %v1295_v12  ;;  %vm381_vm9 = vcmp.eq.s32.totalorder %v73_v43, %v1295_v12 }
  0x41   :  { %1235 = vmatpush1.bf16.msk.msra.mxu1 %vm1234_vm12, %v1246_v15  ;;  %vm1172_vm13 = vmpackc.low %vm176_vm7, %vm174_vm4  ;;  %vm177_vm7 = vcmp.eq.s32.totalorder %v72_v42, %v1297_v13  ;;  %vm179_vm12 = vcmp.eq.s32.totalorder %v73_v43, %v1297_v13 }
  0x42   :  { %1173 = vmatprep.subr.msk.bf16.mxu0 %vm1172_vm13, %v1246_v15  ;;  %vm1236_vm15 = vmpackc.low %vm377_vm8, %vm375_vm10  ;;  %vm378_vm8 = vcmp.eq.s32.totalorder %v72_v42, %v1299_v14  ;;  %vm380_vm13 = vcmp.eq.s32.totalorder %v73_v43, %v1299_v14  ;;  %v1247_v42 = vmov 1966171168  }
  0x43   :  { %1237 = vmatprep.subr.msk.bf16.mxu1 %vm1236_vm15, %v1246_v15  ;;  %vm1174_vm5 = vmpackc.low %vm175_vm14, %vm173_vm11  ;;  %v837_v43 = vunpack.c.l.s4 %v1247_v42 }
  0x44   :  { %1175 = vmatpush1.bf16.msk.msra.mxu0 %vm1174_vm5, %v1246_v15  ;;  %vm1238_vm4 = vmpackc.low %vm376_vm1, %vm374_vm0  ;;  %vm853_vm1 = vcmp.lt.s32.totalorder %v41_v0, 256 }
  0x45   :  { %1239 = vmatpush1.bf16.msk.msra.mxu1 %vm1238_vm4, %v1246_v15  ;;  %vm1176_vm10 = vmpackc.low %vm180_vm3, %vm178_vm2 }
  0x46   :  { %1177 = vmatprep.subr.msk.bf16.mxu0 %vm1176_vm10, %v1246_v15  ;;  %vm1240_vm11 = vmpackc.low %vm381_vm9, %vm379_vm6 }
  0x47   :  { %1241 = vmatprep.subr.msk.bf16.mxu1 %vm1240_vm11, %v1246_v15  ;;  %vm1178_vm14 = vmpackc.low %vm179_vm12, %vm177_vm7 }
  0x48   :  { %1179 = vmatpush1.bf16.msk.msra.mxu0 %vm1178_vm14, %v1246_v15  ;;  %vm1242_vm0 = vmpackc.low %vm380_vm13, %vm378_vm8 }
  0x49   :  { %1243 = vmatpush1.bf16.msk.msra.mxu1 %vm1242_vm0, %v1246_v15 }
  0x4b   :  { %595 = vmatmul.mubr.f32.vlgmr.msra.gmra.mrb[0].mxu0 %v520_v44 }
  0x4c   :  { %730 = vmatmul.mubr.f32.vlgmr.msra.gmra.mrb[0].mxu1 %v655_v45  ;;  %600 = vmatprep.mubr.f32.mxu0 %v523_v46 }
  0x4d   :  { %735 = vmatprep.mubr.f32.mxu1 %v658_v47 }
  0x4f   :  { %601 = vmatmul.mubr.f32.gmra.mrb[2].mxu0 %v522_v48  ;;  %v838_v48 = vunpack.c.0.s8 %v837_v43 }
  0x50   :  { %736 = vmatmul.mubr.f32.gmra.mrb[2].mxu1 %v657_v49  ;;  %606 = vmatprep.mubr.f32.mxu0 %v525_v50 }
  0x51   :  { %741 = vmatprep.mubr.f32.mxu1 %v660_v51 }
  0x53   :  { %607 = vmatmul.mubr.f32.gmra.mrb[4].mxu0 %v524_v52 }
  0x54   :  { %742 = vmatmul.mubr.f32.gmra.mrb[4].mxu1 %v659_v53  ;;  %612 = vmatprep.mubr.f32.mxu0 %v527_v54  ;;  %v841_v53 = vsub.s32 %v838_v48, %v1277_v2 }
  0x55   :  { %747 = vmatprep.mubr.f32.mxu1 %v662_v55 }
  0x57   :  { %613 = vmatmul.mubr.f32.gmra.mrb[6].mxu0 %v526_v56 }
  0x58   :  { %748 = vmatmul.mubr.f32.gmra.mrb[6].mxu1 %v661_v57  ;;  %618 = vmatprep.mubr.f32.mxu0 %v529_v58 }
  0x59   :  { %753 = vmatprep.mubr.f32.mxu1 %v664_v59 }
  0x5b   :  { %619 = vmatmul.mubr.f32.gmra.mrb[8].mxu0 %v528_v60 }
  0x5c   :  { %754 = vmatmul.mubr.f32.gmra.mrb[8].mxu1 %v663_v61 }
 0x11e   :  { %v596_v62 = vpop.f32.mrb[0].mxu0 }
 0x11f   :  { %v731_v63 = vpop.f32.mrb[0].mxu1  ;;  %v598_v1 = vpop.f32.mrb[1].mxu0 }
 0x120   :  { %v803_v3 = vmul.f32 %v731_v63, %v596_v62  ;;  %v733_v4 = vpop.f32.mrb[1].mxu1 }
 0x121   :  { %v804_v5 = vmul.f32 %v733_v4, %v598_v1 }
 0x122   :  { %v602_v6 = vpop.f32.mrb[2].mxu0 }
 0x123   :  { %v737_v7 = vpop.f32.mrb[2].mxu1  ;;  %v604_v8 = vpop.f32.mrb[3].mxu0 }
 0x124   :  { %v805_v9 = vmul.f32 %v737_v7, %v602_v6  ;;  %v739_v10 = vpop.f32.mrb[3].mxu1 }
 0x125   :  { %v806_v11 = vmul.f32 %v739_v10, %v604_v8 }
 0x126   :  { %v813_v12 = vadd.f32 %v805_v9, %v803_v3  ;;  %v608_v13 = vpop.f32.mrb[4].mxu0 }
 0x127   :  { %v823_v14 = vadd.f32 %v806_v11, %v804_v5  ;;  %v743_v15 = vpop.f32.mrb[4].mxu1  ;;  %v610_v16 = vpop.f32.mrb[5].mxu0 }
 0x128   :  { %v807_v17 = vmul.f32 %v743_v15, %v608_v13  ;;  %v745_v18 = vpop.f32.mrb[5].mxu1 }
 0x129   :  { %v808_v19 = vmul.f32 %v745_v18, %v610_v16 }
 0x12a   :  { %v814_v20 = vadd.f32 %v813_v12, %v807_v17  ;;  %v614_v21 = vpop.f32.mrb[6].mxu0 }
 0x12b   :  { %v824_v22 = vadd.f32 %v823_v14, %v808_v19  ;;  %v749_v23 = vpop.f32.mrb[6].mxu1  ;;  %v616_v24 = vpop.f32.mrb[7].mxu0 }
 0x12c   :  { %v809_v25 = vmul.f32 %v749_v23, %v614_v21  ;;  %v751_v26 = vpop.f32.mrb[7].mxu1 }
 0x12d   :  { %v810_v27 = vmul.f32 %v751_v26, %v616_v24 }
 0x12e   :  { %v815_v28 = vadd.f32 %v814_v20, %v809_v25  ;;  %v620_v29 = vpop.f32.mrb[8].mxu0 }
 0x12f   :  { %v825_v30 = vadd.f32 %v824_v22, %v810_v27  ;;  %v755_v31 = vpop.f32.mrb[8].mxu1  ;;  %v622_v32 = vpop.f32.mrb[9].mxu0 }
 0x130   :  { %v811_v33 = vmul.f32 %v755_v31, %v620_v29  ;;  %v757_v34 = vpop.f32.mrb[9].mxu1 }
 0x131   :  { %v812_v35 = vmul.f32 %v757_v34, %v622_v32 }
 0x132   :  { %v816_v36 = vadd.f32 %v815_v28, %v811_v33 }
 0x133   :  { %v826_v37 = vadd.f32 %v825_v30, %v812_v35 }
 0x134   :  { %v817_v38 = vrot.slane %v816_v36, 4 }
 0x135   :  { %v827_v39 = vrot.slane %v826_v37, 4 }
 0x136   :  { %v818_v40 = vadd.f32 %v817_v38, %v816_v36 }
 0x137   :  { %v828_v41 = vadd.f32 %v827_v39, %v826_v37 }
 0x138   :  { %v819_v44 = vrot.slane %v818_v40, 2 }
 0x139   :  { %v829_v45 = vrot.slane %v828_v41, 2 }
 0x13a   :  { %v820_v46 = vadd.f32 %v819_v44, %v818_v40 }
 0x13b   :  { %v830_v47 = vadd.f32 %v829_v45, %v828_v41 }
 0x13c   :  { %v821_v49 = vrot.slane %v820_v46, 1 }
 0x13d   :  { %v831_v50 = vrot.slane %v830_v47, 1 }
 0x13e   :  { %v822_v51 = vadd.f32 %v821_v49, %v820_v46 }
 0x13f   :  { %v832_v52 = vadd.f32 %v831_v50, %v830_v47 }
 0x141   :  { %v835_v54 = vcombine.low %v822_v51, %v832_v52 }
 0x143   :  { %v842_v55 = vrot.slane %v835_v54, %v841_v53 }
 0x145   :  { %v849_v56 = vrot.slane %v842_v55, %v841_v53 }
 0x147   :  { %855 = vst.msk [vmem:[%s1588_s4] sm:$0x3] %vm853_vm1, %v849_v56 }

</bundles_post_ra>
